<compile_context>
chip_gen: v6e
topology: v6e:2x2x1
jax: 0.10.0
libtpu: 0.0.40
codegen_flags: <defaults>
</compile_context>

<pallas_src>
import jax
import jax.numpy as jnp
from jax.experimental import pallas as pl
from jax.experimental.pallas import tpu as pltpu

EPS = 1e-5          # InstanceNorm2d default eps
NEG_SLOPE = 0.2     # LeakyReLU slope


def unet_down_kernel(p_ref, w_ref, b_ref, o_ref):
    # p_ref: (1, K, P) bf16   w_ref: (C_out, K) bf16   b_ref: (C_out, 1) f32
    # o_ref: (1, C_out, P) f32
    # Conv as a single MXU matmul with P (large) on the lane axis; f32 accumulation.
    y = jnp.dot(w_ref[...], p_ref[0], preferred_element_type=jnp.float32)   # (C_out, P)
    y = y + b_ref[...]                                                      # f32 bias add
    # InstanceNorm2d (affine=False, biased variance) per channel over the P lane axis.
    mean = jnp.mean(y, axis=-1, keepdims=True)                              # (C_out, 1)
    cent = y - mean
    var = jnp.mean(cent * cent, axis=-1, keepdims=True)                     # (C_out, 1)
    o_ref[0] = cent * jax.lax.rsqrt(var + EPS)


def unet_down(x, weight, bias):
    """x: (N, C_in, H, W) NCHW f32; weight: (C_out, C_in, 4, 4); bias: (C_out,)."""
    N, C_in, H, W = x.shape
    C_out = weight.shape[0]
    kh = kw = 4
    H_out, W_out = H // 2, W // 2
    P = H_out * W_out
    K = C_in * kh * kw

    # LeakyReLU once on the raw input (before the 4x window replication). leaky(0)=0, so
    # applying it before zero-padding is equivalent to the module's pad-after-activation.
    a = jnp.where(x >= 0, x, NEG_SLOPE * x)
    a = a.astype(jnp.bfloat16)                       # bf16 MXU operands, halves patch HBM bytes
    ap = jnp.pad(a, ((0, 0), (0, 0), (1, 1), (1, 1)))

    # im2col via 16 static strided slices (no XLA gather), directly in (K, P) layout.
    # K is ordered (kh, kw, c_in) with c_in fastest; the weight matrix matches below.
    taps = []
    for dh in range(kh):
        for dw in range(kw):
            t = ap[:, :, dh::2, dw::2][:, :, :H_out, :W_out]      # (N, C_in, H_out, W_out)
            taps.append(t)
    patches_t = jnp.stack(taps, axis=1).reshape(N, K, P)          # (N, K, P) bf16

    w_mat = weight.transpose(0, 2, 3, 1).reshape(C_out, K).astype(jnp.bfloat16)  # (C_out, K)
    b_mat = bias.reshape(C_out, 1).astype(jnp.float32)                           # (C_out, 1)

    # Explicit VMEM budget: double-buffered patch + output blocks, plus resident weights.
    bytes_patch = K * P * 2
    bytes_out = C_out * P * 4
    bytes_w = C_out * K * 2 + C_out * 4
    vmem_limit = 2 * (bytes_patch + bytes_out + bytes_w) + (2 << 20)
    vmem_limit = max(min(vmem_limit, 100 << 20), 4 << 20)

    out = pl.pallas_call(
        unet_down_kernel,
        out_shape=jax.ShapeDtypeStruct((N, C_out, P), jnp.float32),
        grid_spec=pltpu.PrefetchScalarGridSpec(
            num_scalar_prefetch=0,
            grid=(N,),
            in_specs=[
                pl.BlockSpec((1, K, P), lambda n: (n, 0, 0)),
                pl.BlockSpec((C_out, K), lambda n: (0, 0)),
                pl.BlockSpec((C_out, 1), lambda n: (0, 0)),
            ],
            out_specs=pl.BlockSpec((1, C_out, P), lambda n: (n, 0, 0)),
        ),
        compiler_params=pltpu.CompilerParams(
            dimension_semantics=("parallel",),
            vmem_limit_bytes=vmem_limit,
        ),
    )(patches_t, w_mat, b_mat)

    # (N, C_out, P) is already NCHW up to a trivial reshape (no transpose needed).
    return out.reshape(N, C_out, H_out, W_out)


def unet_down_reference(x, weight, bias, matmul_dtype=jnp.float32):
    """Pure-JAX reference of the PyTorch forward. matmul_dtype lets us precision-match
    the kernel's bf16 MXU operands (accumulation stays f32 either way)."""
    a = jnp.where(x >= 0, x, NEG_SLOPE * x)
    y = jax.lax.conv_general_dilated(
        a.astype(matmul_dtype), weight.astype(matmul_dtype),
        window_strides=(2, 2), padding=((1, 1), (1, 1)),
        dimension_numbers=("NCHW", "OIHW", "NCHW"),
        preferred_element_type=jnp.float32)
    y = y + bias[None, :, None, None].astype(jnp.float32)
    mean = jnp.mean(y, axis=(2, 3), keepdims=True)
    var = jnp.mean((y - mean) ** 2, axis=(2, 3), keepdims=True)
    return (y - mean) * jax.lax.rsqrt(var + EPS)


if __name__ == "__main__":
    # Small shapes consistent with the module: in_size=4, out_size=8, H=W=16.
    N, C_in, H, W = 2, 4, 16, 16
    C_out = 8

    key = jax.random.PRNGKey(0)
    kx, kw_, kb = jax.random.split(key, 3)
    x = jax.random.normal(kx, (N, C_in, H, W), dtype=jnp.float32)
    weight = 0.1 * jax.random.normal(kw_, (C_out, C_in, 4, 4), dtype=jnp.float32)
    bias = 0.1 * jax.random.normal(kb, (C_out,), dtype=jnp.float32)

    out = unet_down(x, weight, bias)
    out = jax.block_until_ready(out)
    assert out.shape == (N, C_out, H // 2, W // 2), out.shape

    # Tight check against a precision-matched (bf16-operand, f32-accumulate) reference.
    ref_bf16 = unet_down_reference(x, weight, bias, matmul_dtype=jnp.bfloat16)
    assert jnp.allclose(out, ref_bf16, atol=2e-3, rtol=2e-3), \
        float(jnp.max(jnp.abs(out - ref_bf16)))

    # Loose semantic check against the full-f32 PyTorch-equivalent reference
    # (tolerance relaxed because the kernel uses bf16 MXU operands).
    ref_f32 = unet_down_reference(x, weight, bias)
    assert jnp.allclose(out, ref_f32, atol=5e-2, rtol=5e-2), \
        float(jnp.max(jnp.abs(out - ref_f32)))

    print("KERNEL_OK")
</pallas_src>

<mosaic_0001>
module attributes {stable_mosaic.version = 11 : i64} {
  func.func @unet_down_kernel(%arg0: i32, %arg1: memref<1x64x64xbf16, #tpu.memory_space<vmem>>, %arg2: memref<8x64xbf16, #tpu.memory_space<vmem>>, %arg3: memref<8x1xf32, #tpu.memory_space<vmem>>, %arg4: memref<1x8x64xf32, #tpu.memory_space<vmem>>) attributes {dimension_semantics = [#tpu.dimension_semantics<parallel>], iteration_bounds = array<i64: 2>, scalar_prefetch = 0 : i64, scratch_operands = 0 : i64, tpu.core_type = #tpu.core_type<tc>, window_params = [{transform_indices = @transform_0, window_bounds = array<i64: 1, 64, 64>}, {pipeline_mode = #tpu.pipeline_mode<synchronous>, transform_indices = @transform_1, window_bounds = array<i64: 8, 64>}, {pipeline_mode = #tpu.pipeline_mode<synchronous>, transform_indices = @transform_2, window_bounds = array<i64: 8, 1>}, {transform_indices = @transform_3, window_bounds = array<i64: 1, 8, 64>}]} {
    %c0 = arith.constant 0 : index
    %c0_0 = arith.constant 0 : index
    %0 = vector.load %arg2[%c0, %c0_0] : memref<8x64xbf16, #tpu.memory_space<vmem>>, vector<8x64xbf16>
    %c0_1 = arith.constant 0 : index
    %c0_2 = arith.constant 0 : index
    %c0_3 = arith.constant 0 : index
    %1 = vector.load %arg1[%c0_1, %c0_2, %c0_3] : memref<1x64x64xbf16, #tpu.memory_space<vmem>>, vector<1x64x64xbf16>
    %2 = vector.shape_cast %1 : vector<1x64x64xbf16> to vector<64x64xbf16>
    %cst = arith.constant dense<0.000000e+00> : vector<8x64xf32>
    %3 = tpu.matmul %0, %2, %cst {dimension_numbers = #tpu.dot_dimension_numbers<[1], [0], [0], [1], [0, 0, 1, 1], [], []>} : vector<8x64xbf16>, vector<64x64xbf16>, vector<8x64xf32> -> vector<8x64xf32>
    %c0_4 = arith.constant 0 : index
    %c0_5 = arith.constant 0 : index
    %4 = vector.load %arg3[%c0_4, %c0_5] : memref<8x1xf32, #tpu.memory_space<vmem>>, vector<8x1xf32>
    %5 = vector.broadcast %4 : vector<8x1xf32> to vector<8x64xf32>
    %6 = arith.addf %3, %5 : vector<8x64xf32>
    %cst_6 = arith.constant dense<0.000000e+00> : vector<8xf32>
    %7 = vector.multi_reduction <add>, %6, %cst_6 [1] : vector<8x64xf32> to vector<8xf32>
    %8 = vector.shape_cast %7 : vector<8xf32> to vector<8x1xf32>
    %cst_7 = arith.constant 6.400000e+01 : f32
    %9 = vector.broadcast %cst_7 : f32 to vector<8x1xf32>
    %10 = arith.divf %8, %9 : vector<8x1xf32>
    %11 = vector.broadcast %10 : vector<8x1xf32> to vector<8x64xf32>
    %12 = arith.subf %6, %11 : vector<8x64xf32>
    %13 = arith.mulf %12, %12 : vector<8x64xf32>
    %cst_8 = arith.constant dense<0.000000e+00> : vector<8xf32>
    %14 = vector.multi_reduction <add>, %13, %cst_8 [1] : vector<8x64xf32> to vector<8xf32>
    %15 = vector.shape_cast %14 : vector<8xf32> to vector<8x1xf32>
    %cst_9 = arith.constant 6.400000e+01 : f32
    %16 = vector.broadcast %cst_9 : f32 to vector<8x1xf32>
    %17 = arith.divf %15, %16 : vector<8x1xf32>
    %cst_10 = arith.constant 9.99999974E-6 : f32
    %18 = vector.broadcast %cst_10 : f32 to vector<8x1xf32>
    %19 = arith.addf %17, %18 : vector<8x1xf32>
    %20 = math.rsqrt %19 : vector<8x1xf32>
    %21 = vector.broadcast %20 : vector<8x1xf32> to vector<8x64xf32>
    %22 = arith.mulf %12, %21 : vector<8x64xf32>
    %c0_11 = arith.constant 0 : index
    %c0_12 = arith.constant 0 : index
    %c0_13 = arith.constant 0 : index
    %23 = vector.load %arg4[%c0_11, %c0_12, %c0_13] : memref<1x8x64xf32, #tpu.memory_space<vmem>>, vector<1x8x64xf32>
    %24 = vector.shape_cast %23 : vector<1x8x64xf32> to vector<8x64xf32>
    %25 = vector.shape_cast %22 : vector<8x64xf32> to vector<1x8x64xf32>
    tpu.vector_store %arg4[%c0_11, %c0_12, %c0_13], %25 {strides = array<i32>} : memref<1x8x64xf32, #tpu.memory_space<vmem>>, vector<1x8x64xf32>,
    return
  }
  func.func @transform_0(%arg0: i32) -> (i32, i32, i32) {
    %c0_i32 = arith.constant 0 : i32
    %c0_i32_0 = arith.constant 0 : i32
    %c0_i32_1 = arith.constant 0 : i32
    return %arg0, %c0_i32, %c0_i32_0 : i32, i32, i32
  }
  func.func @transform_1(%arg0: i32) -> (i32, i32) {
    %c0_i32 = arith.constant 0 : i32
    %c0_i32_0 = arith.constant 0 : i32
    %c0_i32_1 = arith.constant 0 : i32
    return %c0_i32, %c0_i32_0 : i32, i32
  }
  func.func @transform_2(%arg0: i32) -> (i32, i32) {
    %c0_i32 = arith.constant 0 : i32
    %c0_i32_0 = arith.constant 0 : i32
    %c0_i32_1 = arith.constant 0 : i32
    return %c0_i32, %c0_i32_0 : i32, i32
  }
  func.func @transform_3(%arg0: i32) -> (i32, i32, i32) {
    %c0_i32 = arith.constant 0 : i32
    %c0_i32_0 = arith.constant 0 : i32
    %c0_i32_1 = arith.constant 0 : i32
    return %arg0, %c0_i32, %c0_i32_0 : i32, i32, i32
  }
}

</mosaic_0001>

<bundles_post_ra>
// kernel: tpu_custom_call.1
= control target key start
LH: loop header
LB: loop body
LE: loop exit
PB: predicated region body
PF: predicated region fallthrough
CT: control target
= control target key end

     0   :  { %8 = vsyncpa [#allocation3], 0  ;;  %s738_s0 = inlined_call_operand.hbm [shape: bf16[2,64,64], index: 0, kind: input, shape index: {}]   ;;  %s739_s1 = inlined_call_operand.vmem [shape: bf16[8,64], index: 1, kind: input, shape index: {}]   ;;  %s740_s2 = inlined_call_operand.vmem [shape: f32[8,1], index: 2, kind: input, shape index: {}]   ;;  %s741_s3 = inlined_call_operand.hbm [shape: f32[2,8,64], index: 3, kind: output, shape index: {}]  }
   0x1   :  { %10 = vsyncpa [#allocation3 + $0x1], 0 }
   0x2   :  { %11 = vsyncpa [#allocation4], 0 }
   0x3   :  { %13 = vsyncpa [#allocation4 + $0x1], 0  ;;  %s587_s12 = smov 0   ;;  %s589_s13 = smov 0  }
   0x4   :  { %s591_s14 = smov 0   ;;  %s593_s15 = smov 0  }
   0x5 LB: > { %s608_s16 = sadd.s32 4294967295, %s558_s15   ;;  %s372_s17 = sadd.s32 4294967294, %s558_s15   ;;  %s558_s15 = sphi %s593_s15, %s756_s15   ;;  %s554_s14 = sphi %s591_s14, %s755_s14   ;;  %s550_s13 = sphi %s589_s13, %s754_s13   ;;  %s546_s12 = sphi %s587_s12, %s753_s12  }
   0x6   : > { %s612_s18 = sadd.s32 1, %s558_s15   ;;  %s26_s19 = sadd.s32 1, %s554_s14 }
   0x7   : > { %s23_s20 = ssub.s32 %s558_s15, %s612_s18  ;;  %p33_p0 = scmp.ne.s32.totalorder %s554_s14, %s550_s13 }
   0x8   : > { %p24_p1 = scmp.eq.s32.totalorder %s23_s20, 0  ;;  %p34_p2 = scmp.eq.s32.totalorder %s558_s15, 0 }
   0x9   : > { %p39_p3 = scmp.ne.s32.totalorder %s550_s13, %s546_s12  ;;  %p40_p4 = scmp.eq.s32.totalorder %s608_s16, 0 }
   0xa   : > { %s624_s21 = scalar_select %p24_p1, %s554_s14, %s26_s19  }
   0xb   : > { %p626_p5 = por %p34_p2, %p33_p0  ;;  %p630_p6 = por %p40_p4, %p39_p3 }
   0xc   : > { %p105_p7 = scmp.eq.s32.totalorder %s608_s16, 1  ;;  %p111_p8 = scmp.eq.s32.totalorder %s372_s17, 1 }
   0xd   : > { %s745_s23 = scalar_select %p630_p6, 1, 0 }
   0xe   : > { %p420_p10 = scmp.lt.s32.totalorder %s558_s15, 2  ;;  %p637_p11 = por %p105_p7, %p33_p0 }
   0xf   : > { %p641_p12 = por %p111_p8, %p39_p3  ;;  %s137_s26 = sand.u32 1, %s554_s14  }
  0x10   : > { %s746_s24 = scalar_select %p637_p11, 1, 0 }
  0x11   : > { %s747_s25 = scalar_select %p641_p12, 1, 0 }
  0x12   : > { %s390_s27 = sshll.u32 %s558_s15, 9  ;;  %s375_s28 = sshll.u32 %s137_s26, 5 }
  0x13   : > { %s650_s4 = scalar_lea.hbm %s738_s0, %s390_s27  ;;  %s141_s5 = scalar_lea.vmem [#allocation2], %s375_s28 }
  0x14   : > { %s148_s6 = sshll.u32 %s141_s5, 4  ;;  %p654_p13 = pnand %p420_p10, %p626_p5  ;;  %s658_s6 = int_to_ptr.vmem [resolvable:$true] %s148_s6 }
  0x15   : > { %s660_s8 = scalar_lea.sflag [#allocation3], %s137_s26  ;;  %s466_s9 = scalar_lea.hbm %s650_s4, 512 }
  0x16   : > { %p467_p0 = scmp.ne.s32.totalorder %s650_s4, %s466_s9  ;;  %p468_p1 = pneg %p654_p13 }
  0x17   : > { %s471_s17 = scalar_lea.hbm %s738_s0, 1024  ;;  %p472_p4 = scmp.lt.s32.totalorder %s650_s4, %s738_s0 }
  0x18   : > { %p469_p2 = pnand %p468_p1, %p467_p0  ;;  %p473_p5 = scmp.lt.s32.totalorder %s471_s17, %s466_s9 }
  0x1a   : > { %p470_p3 = pneg %p469_p2  ;;  %p474_p7 = por %p473_p5, %p472_p4 }
  0x1c   : > { %p475_p8 = pnand %p474_p7, %p470_p3 }
  0x1e   : > { %478 = shalt.err (!%p475_p8)
}
  0x1f   : > { %s479_s22 = scalar_lea.vmem %s658_s6, 512  ;;  %s560_s26 = smov [#allocation2]  }
  0x20   : > { %p480_p10 = scmp.ne.s32.totalorder %s658_s6, %s479_s22  ;;  %s484_s27 = sshll.u32 %s560_s26, 4  ;;  %s485_s27 = int_to_ptr.vmem [resolvable:$false] %s484_s27 }
  0x21   : > { %s486_s28 = scalar_lea.vmem %s485_s27, 1024  ;;  %p487_p2 = scmp.lt.s32.totalorder %s658_s6, %s485_s27 }
  0x22   : > { %p482_p9 = pnand %p480_p10, %p468_p1  ;;  %p488_p12 = scmp.lt.s32.totalorder %s486_s28, %s479_s22 }
  0x24   : > { %p483_p0 = pneg %p482_p9  ;;  %p489_p11 = por %p488_p12, %p487_p2 }
  0x26   : > { %p490_p6 = pnand %p489_p11, %p483_p0 }
  0x28   : > { %493 = shalt.err (!%p490_p6)
}
  0x29   : > { %s561_s29 = smov 64   ;;  %s562_s30 = smov 4  }
  0x2a   : > { %415 = dma.hbm_to_vmem [thread:$0]  (!%p654_p13), %s650_s4, 512, %s658_s6, %s660_s8, %s561_s29, %s561_s29, %s562_s30  }
  0x2b   : > { %p378_p9 = scmp.ge.s32.totalorder %s558_s15, 1  ;;  %p156_p1 = scmp.lt.s32.totalorder %s558_s15, 3 }
  0x2d   : > { %p157_p3 = pnand %p378_p9, %p156_p1 }
  0x2e   : > { %s684_s5 = sand.u32 (!%p157_p3), 1, %s550_s13   ;;  %p749_p6 = scmp.ne.s32.totalorder (!%p157_p3), %s745_s23, 0 }
  0x2f   : > { %160 = sbr.rel (%p157_p3) target bundleno = 582 (0x246), region = 32  ;;  %s379_s9 = sshll.u32 (!%p157_p3), %s684_s5, 5 }
  0x30   : > { %s163_s10 = scalar_lea.sflag (!%p157_p3), [#allocation3], %s684_s5  ;;  %s166_s11 = scalar_lea.vmem (!%p157_p3), [#allocation2], %s379_s9 }
  0x34   : > { %537 = dma.done.wait (%p749_p6), %s163_s10, 512  }
  0x35   : > { %539 = vsyncadd (%p749_p6), %s163_s10, 4294966784  ;;  %v563_v0 = vmov 0.0   ;;  %vm564_vm0 = vmmov 0   ;;  %v565_v1 = vmov 0   ;;  %v460_v2 = vld [vmem:[%s166_s11 + $0x18] sm:$0xff]   ;;  %v461_v3 = vld [vmem:[%s166_s11 + $0x10] sm:$0xff]  }
  0x36   : > { %396 = vmatprep.subr.bf16.mxu0 %v563_v0  ;;  %404 = vmatprep.mubr.msk.bf16.mxu0 %vm564_vm0, %v563_v0  ;;  %v199_v4 = vld [vmem:[%s740_s2] sm:$0xff]  ;;  %v462_v5 = vld [vmem:[%s166_s11 + $0x8] sm:$0xff]   ;;  %vm229_vm1 = vcmask 523264   ;;  %s380_s8 = sshll.u32 %s684_s5, 3  ;;  %s387_s17 = sshll.u32 %s608_s16, 7 }
  0x37   : > { %459 = vset.pattern.permute.xlu0 %v565_v1  ;;  %397 = vmatpush3.bf16.msra.mxu0 %v460_v2  ;;  %v463_v6 = vld [vmem:[%s166_s11] sm:$0xff]   ;;  %s188_s19 = scalar_lea.vmem [#allocation5], %s380_s8  ;;  %s300_s27 = scalar_lea.hbm %s741_s3, %s387_s17 }
  0x38   : > { %398 = vmatprep.subr.bf16.mxu0 %v563_v0  ;;  %202 = vperm.xlu0 %459, %v199_v4   ;;  %v190_v7 = vld [vmem:[%s739_s1] sm:$0xf]  ;;  %s302_s20 = sshll.u32 %s188_s19, 4  ;;  %s289_s28 = scalar_lea.sflag [#allocation4], %s684_s5  ;;  %s303_s20 = int_to_ptr.vmem [resolvable:$true] %s302_s20 }
  0x39   : > { %s494_s29 = scalar_lea.vmem %s303_s20, 128  ;;  %p750_p12 = scmp.ne.s32.totalorder %s746_s24, 0 }
  0x3a   : > { %p495_p11 = scmp.ne.s32.totalorder %s303_s20, %s494_s29  ;;  %s566_s30 = smov [#allocation5]  }
  0x3b   : > { %399 = vmatpush3.bf16.msra.mxu0 %v461_v3  ;;  %s498_s9 = sshll.u32 %s566_s30, 4  ;;  %s499_s9 = int_to_ptr.vmem [resolvable:$false] %s498_s9 }
  0x3c   : > { %400 = vmatprep.subr.bf16.mxu0 %v563_v0  ;;  %p496_p13 = pnand %p495_p11, %p750_p12  ;;  %s500_s16 = scalar_lea.vmem %s499_s9, 256 }
  0x3d   : > { %p501_p5 = scmp.lt.s32.totalorder %s303_s20, %s499_s9  ;;  %p502_p7 = scmp.lt.s32.totalorder %s500_s16, %s494_s29 }
  0x3e   : > { %p497_p4 = pneg %p496_p13 }
  0x3f   : > { %401 = vmatpush3.bf16.msra.mxu0 %v462_v5  ;;  %p503_p8 = por %p502_p7, %p501_p5 }
  0x40   : > { %402 = vmatprep.subr.bf16.mxu0 %v563_v0 }
  0x41   : > { %p504_p10 = pnand %p503_p8, %p497_p4 }
  0x43   : > { %403 = vmatpush3.bf16.msra.mxu0 %v463_v6 }
  0x46   : > { %405 = vmatmul.mubr.msk.bf16.vlgmr.msra.gmra.mxu0 %vm229_vm1, %v190_v7 }
  0xb3   : > { %v203_v8 = vpop.permute.xlu0 %202 }
 0x106   : > { %v267_v9 = vpop.f32.mrf.mxu0 }
 0x107   : > { %v268_v10 = vadd.f32 %v267_v9, %v203_v8 }
 0x108   : > { %v406_v11 = vpop.f32.mrf.mxu0 }
 0x109   : > { %v273_v12 = vsel %vm229_vm1, %v268_v10, 0.0 }
 0x10a   : > { %274 = vadd.xlane.f32.xlu0 %v273_v12  ;;  %v270_v13 = vpop.f32.mrf.mxu0 }
 0x10c   : > { %v407_v14 = vpop.f32.mrf.mxu0 }
 0x193   : > { %v275_v15 = vpop.xlane.xlu0 %274 }
 0x194   : > { %v277_v16 = vmul.f32 0.015625, %v275_v15 }
 0x196   : > { %v278_v17 = vsub.f32 %v268_v10, %v277_v16 }
 0x198   : > { %v279_v18 = vmul.f32 %v278_v17, %v278_v17 }
 0x19a   : > { %v280_v19 = vsel %vm229_vm1, %v279_v18, 0.0 }
 0x19b   : > { %281 = vadd.xlane.f32.xlu1 %v280_v19 }
 0x224   : > { %v282_v20 = vpop.xlane.xlu1 %281 }
 0x225   : > { %v283_v21 = vmul.f32 0.015625, %v282_v20 }
 0x227   : > { %v284_v22 = vadd.f32 1e-05, %v283_v21 }
 0x229   : > { %464 = vrsqrt.f32 %v284_v22 }
 0x236   : > { %v465_v23 = vpop.eup %464 }
 0x237   : > { %v286_v24 = vmul.f32 %v465_v23, %v278_v17 }
 0x239   : > { %287 = vst.msk [vmem:[%s188_s19] sm:$0xff] %vm229_vm1, %v286_v24 }
 0x23a   : > { %507 = shalt.err (!%p504_p10)
}
 0x23b   : > { %s508_s10 = scalar_lea.hbm %s300_s27, 128  ;;  %s512_s4 = scalar_lea.hbm %s741_s3, 256 }
 0x23c   : > { %p509_p0 = scmp.ne.s32.totalorder %s300_s27, %s508_s10  ;;  %p513_p1 = scmp.lt.s32.totalorder %s300_s27, %s741_s3 }
 0x23d   : > { %p514_p3 = scmp.lt.s32.totalorder %s512_s4, %s508_s10 }
 0x23e   : > { %p510_p2 = pnand %p509_p0, %p750_p12 }
 0x23f   : > { %p515_p6 = por %p514_p3, %p513_p1 }
 0x240   : > { %p511_p9 = pneg %p510_p2 }
 0x242   : > { %p516_p11 = pnand %p515_p6, %p511_p9 }
 0x244   : > { %519 = shalt.err (!%p516_p11)
}
 0x245   : > { %410 = dma.vmem_to_hbm [thread:$0]  (%p750_p12), %s303_s20, 128, %s300_s27, %s289_s28  }
 0x246 PF: > { %s314_s7 = sand.u32 1, %s546_s12   ;;  %p751_p13 = scmp.ne.s32.totalorder %s747_s25, 0 }
 0x247   : > { %p752_p4 = scmp.ge.s32.totalorder %s558_s15, 2  ;;  %s315_s8 = scalar_lea.sflag [#allocation4], %s314_s7 }
 0x249   : > { %p417_p5 = pnand %p752_p4, %p751_p13 }
 0x24b   : > { %p418_p7 = pneg %p417_p5 }
 0x24d   : > { %541 = dma.done.wait (%p418_p7), %s315_s8, 128  }
 0x24e   : > { %543 = vsyncadd (%p418_p7), %s315_s8, 4294967168  ;;  %p16_p8 = scmp.ge.s32.totalorder %s612_s18, 4   ;;  %s753_s12 = smov %s550_s13 }
 0x24f   : > { %s754_s13 = smov %s554_s14  ;;  %s755_s14 = smov %s624_s21 }
 0x250   : > { %s756_s15 = smov %s612_s18  ;;  %18 = sbr.rel (!%p16_p8) target bundleno = 5 (0x5), region = 77 }
 0x255   :  { %320 = vsyncpa [#allocation3], 1 }
 0x256   :  { %322 = vsyncpa [#allocation3 + $0x1], 1 }
 0x257   :  { %323 = vsyncpa [#allocation4], 1 }
 0x258   :  { %325 = vsyncpa [#allocation4 + $0x1], 1 }

</bundles_post_ra>
